<compile_context>
chip_gen: v6e
topology: v6e:2x2x1
jax: 0.10.0
libtpu: 0.0.40
codegen_flags: <defaults>
</compile_context>

<pallas_src>
import functools

import numpy as np
import jax
import jax.numpy as jnp
from jax import lax
from jax.experimental import pallas as pl
from jax.experimental.pallas import tpu as pltpu


def _round_up(x, m):
    return ((x + m - 1) // m) * m


def _pad_axis(a, axis, target):
    pad = target - a.shape[axis]
    if pad <= 0:
        return a
    widths = [(0, 0)] * a.ndim
    widths[axis] = (0, pad)
    return jnp.pad(a, widths)


# ----------------------------------------------------------------------------
# Kernel 1: Conv1d(k=10, stride=1, pre-padded) + ReLU + MaxPool1d(3,3) + mask.
# Grid over batch ("parallel": rows are independent -> both TensorCores on v7x).
# ----------------------------------------------------------------------------
def conv_relu_pool_mask_kernel(xp_ref, w_ref, b_ref, m_ref, o_ref, scr_ref):
    # xp_ref: (1, L_pad, C_in)   pre-padded input (channels last)
    # w_ref : (K, C_in, C_out)   C_out zero-padded to a multiple of 128
    # b_ref : (1, C_out)
    # m_ref : (1, L_pool, 1)     keep-mask (1.0 where t < length)
    # o_ref : (1, L_pool, C_out)
    # scr_ref: (L_out, C_out) f32 conv+relu result
    K = w_ref.shape[0]
    C_out = w_ref.shape[2]
    L_out = xp_ref.shape[1] - K + 1
    L_pool = o_ref.shape[1]

    acc = jnp.zeros((L_out, C_out), jnp.float32)
    for k in range(K):  # static unroll over kernel taps; accumulate in registers
        acc = acc + jnp.dot(xp_ref[0, k:k + L_out, :], w_ref[k],
                            preferred_element_type=jnp.float32)
    scr_ref[...] = jnp.maximum(acc + b_ref[...], 0.0)

    # Vectorized MaxPool1d(kernel=3, stride=3): three strided sublane views,
    # two VPU max ops, a single lane-dense masked store.
    p0 = scr_ref[pl.ds(0, L_pool, stride=3), :]
    p1 = scr_ref[pl.ds(1, L_pool, stride=3), :]
    p2 = scr_ref[pl.ds(2, L_pool, stride=3), :]
    pooled = jnp.maximum(jnp.maximum(p0, p1), p2)
    o_ref[0, :, :] = pooled * m_ref[0, :, :]


def conv_relu_pool_mask(xp, w, b, mask, l_pool):
    B, L_pad, C_in = xp.shape
    K, _, C_out = w.shape
    L_out = L_pad - K + 1
    return pl.pallas_call(
        conv_relu_pool_mask_kernel,
        out_shape=jax.ShapeDtypeStruct((B, l_pool, C_out), jnp.float32),
        grid=(B,),
        in_specs=[
            pl.BlockSpec((1, L_pad, C_in), lambda b_: (b_, 0, 0)),
            pl.BlockSpec((K, C_in, C_out), lambda b_: (0, 0, 0)),
            pl.BlockSpec((1, C_out), lambda b_: (0, 0)),
            pl.BlockSpec((1, l_pool, 1), lambda b_: (b_, 0, 0)),
        ],
        out_specs=pl.BlockSpec((1, l_pool, C_out), lambda b_: (b_, 0, 0)),
        scratch_shapes=[pltpu.VMEM((L_out, C_out), jnp.float32)],
        compiler_params=pltpu.CompilerParams(dimension_semantics=("parallel",)),
    )(xp, w, b, mask)


# ----------------------------------------------------------------------------
# Kernel 2: batched, masked bidirectional LSTM (packed-sequence semantics).
# Single program; whole batch processed at once; input projection hoisted out of
# the recurrence; forward/backward directions interleaved in one fori_loop.
# Gate order follows PyTorch: i | f | g | o ; biases b_ih + b_hh are pre-folded.
# ----------------------------------------------------------------------------
def bilstm_kernel(x_ref, len_ref, wih_ref, whh_f_ref, b_f_ref, whh_b_ref, b_b_ref,
                  y_ref, hn_ref, cn_ref, xw_ref, *, T, B):
    # x_ref  : (T*B, C)   time-major, flattened: row t*B + b = x[b, t, :]
    # len_ref: (B, 1) int32 valid lengths
    # wih_ref: (C, 8H)    [forward Wih | backward Wih]
    # whh_*  : (H, 4H)    b_* : (1, 4H)
    # y_ref  : (T*B, 2H)  hn_ref / cn_ref: (B, 2H)
    # xw_ref : (T*B, 8H) f32 scratch holding the hoisted input projection
    H = whh_f_ref.shape[0]

    # One big MXU matmul outside the serial recurrence.
    xw_ref[...] = jnp.dot(x_ref[...], wih_ref[...],
                          preferred_element_type=jnp.float32)

    lens = len_ref[...]                                      # (B, 1) int32

    def cell(gx, h, c, whh_r, b_r, keep):
        gates = (gx + jnp.dot(h, whh_r[...], preferred_element_type=jnp.float32)
                 + b_r[...])
        i = jax.nn.sigmoid(gates[:, 0:H])
        f = jax.nn.sigmoid(gates[:, H:2 * H])
        g = jnp.tanh(gates[:, 2 * H:3 * H])
        o = jax.nn.sigmoid(gates[:, 3 * H:4 * H])
        c_new = f * c + i * g
        h_new = o * jnp.tanh(c_new)
        # packed-sequence semantics: freeze state past each sequence's length
        return jnp.where(keep, h_new, h), jnp.where(keep, c_new, c)

    zeros = jnp.zeros((B, H), jnp.float32)

    def body(t, carry):
        hf, cf, hb, cb = carry
        tb = T - 1 - t
        keep_f = lens > t                                    # (B, 1) bool
        keep_b = lens > tb
        xw_f = xw_ref[pl.ds(t * B, B), :]                    # (B, 8H)
        xw_b = xw_ref[pl.ds(tb * B, B), :]
        hf, cf = cell(xw_f[:, 0:4 * H], hf, cf, whh_f_ref, b_f_ref, keep_f)
        hb, cb = cell(xw_b[:, 4 * H:8 * H], hb, cb, whh_b_ref, b_b_ref, keep_b)
        # y is a VMEM-resident output buffer; the HBM writeback is one DMA at the end.
        y_ref[pl.ds(t * B, B), 0:H] = jnp.where(keep_f, hf, 0.0)
        y_ref[pl.ds(tb * B, B), H:2 * H] = jnp.where(keep_b, hb, 0.0)
        return hf, cf, hb, cb

    hf, cf, hb, cb = lax.fori_loop(0, T, body, (zeros, zeros, zeros, zeros))

    hn_ref[:, 0:H] = hf
    hn_ref[:, H:2 * H] = hb
    cn_ref[:, 0:H] = cf
    cn_ref[:, H:2 * H] = cb


def bilstm(x_flat, lens, wih_cat, whh_f, b_f, whh_b, b_b, T, B):
    H = whh_f.shape[0]
    # TODO(synk): for very large T*B, tile the hoisted projection over time chunks
    # (emit_pipeline) to stay within v7x's 64 MiB VMEM; at these sizes it all fits.
    return pl.pallas_call(
        functools.partial(bilstm_kernel, T=T, B=B),
        out_shape=(jax.ShapeDtypeStruct((T * B, 2 * H), jnp.float32),
                   jax.ShapeDtypeStruct((B, 2 * H), jnp.float32),
                   jax.ShapeDtypeStruct((B, 2 * H), jnp.float32)),
        scratch_shapes=[pltpu.VMEM((T * B, 8 * H), jnp.float32)],
    )(x_flat, lens, wih_cat, whh_f, b_f, whh_b, b_b)


# ----------------------------------------------------------------------------
# Kernel 3: attention decoder (set2set-style unroll) + final linear head.
# Single program; attention steps run in a fori_loop carrying (token, hn, cn).
# ----------------------------------------------------------------------------
def decoder_kernel(x_ref, h0_ref, c0_ref, wih_ref, whh_ref, b_ref,
                   wo_ref, bo_ref, o_ref, *, steps):
    B, T, D = x_ref.shape                                    # D = 2*lstm_dim

    def body(_, carry):
        token, hn, cn = carry
        gates = (jnp.dot(token, wih_ref[...], preferred_element_type=jnp.float32)
                 + jnp.dot(hn, whh_ref[...], preferred_element_type=jnp.float32)
                 + b_ref[...])
        i = jax.nn.sigmoid(gates[:, 0:D])
        f = jax.nn.sigmoid(gates[:, D:2 * D])
        g = jnp.tanh(gates[:, 2 * D:3 * D])
        o = jax.nn.sigmoid(gates[:, 3 * D:4 * D])
        cn = f * cn + i * g
        hn = o * jnp.tanh(cn)
        x = x_ref[...]                                       # (B, T, D)
        scores = jnp.sum(x * hn[:, None, :], axis=-1)        # (B, T)
        scores = scores - jnp.max(scores, axis=-1, keepdims=True)
        e = jnp.exp(scores)
        attn = e * pl.reciprocal(jnp.sum(e, axis=-1, keepdims=True), approx=True)
        context = jnp.sum(x * attn[:, :, None], axis=1)      # (B, D)
        token = jnp.concatenate([context, hn], axis=-1)      # (B, 2D)
        return token, hn, cn

    token0 = jnp.zeros((B, 2 * D), jnp.float32)
    token, _, _ = lax.fori_loop(0, steps, body,
                                (token0, h0_ref[...], c0_ref[...]))
    o_ref[...] = (jnp.dot(token, wo_ref[...], preferred_element_type=jnp.float32)
                  + bo_ref[...])


def decoder(x, hn, cn, params, steps):
    B = x.shape[0]
    n_classes = params["out_w"].shape[1]
    return pl.pallas_call(
        functools.partial(decoder_kernel, steps=steps),
        out_shape=jax.ShapeDtypeStruct((B, n_classes), jnp.float32),
    )(x, hn, cn, params["dec_wih"], params["dec_whh"], params["dec_b"],
      params["out_w"], params["out_b"])


# ----------------------------------------------------------------------------
# Full forward pass (glue in plain JAX / numpy for masks, padding, transposes).
# ----------------------------------------------------------------------------
def rnatracker_forward(x, batch_len, params, decoder_unroll_steps=10):
    B, L, _ = x.shape
    batch_len = np.asarray(batch_len)

    conv_dim = params["w1"].shape[2]
    H = params["whh_f"].shape[0]
    Cp = _round_up(conv_dim, 128)

    # Zero-pad conv output channels (and matching downstream weight rows) to a
    # lane-dense multiple of 128.  Exact: padded channels are identically zero.
    w1 = _pad_axis(params["w1"], 2, Cp)
    b1 = _pad_axis(params["b1"], 1, Cp)
    w2 = _pad_axis(_pad_axis(params["w2"], 1, Cp), 2, Cp)
    b2 = _pad_axis(params["b2"], 1, Cp)
    wih_cat = jnp.concatenate([_pad_axis(params["wih_f"], 0, Cp),
                               _pad_axis(params["wih_b"], 0, Cp)], axis=1)  # (Cp, 8H)

    # conv1 + relu + maxpool(3) + length mask
    xp = jnp.pad(x, ((0, 0), (5, 5), (0, 0)))
    L1 = (L + 1) // 3
    len1 = (batch_len + 1) // 3
    mask1 = jnp.asarray((np.arange(L1)[None, :] < len1[:, None])
                        .astype(np.float32)[:, :, None])
    h1 = conv_relu_pool_mask(xp, w1, b1, mask1, L1)

    # conv2 + relu + maxpool(3) + length mask
    h1p = jnp.pad(h1, ((0, 0), (5, 5), (0, 0)))
    L2 = (L1 + 1) // 3
    len2 = (len1 + 1) // 3
    mask2 = jnp.asarray((np.arange(L2)[None, :] < len2[:, None])
                        .astype(np.float32)[:, :, None])
    h2 = conv_relu_pool_mask(h1p, w2, b2, mask2, L2)

    # batched packed bidirectional LSTM (masked); dropout layers identity (eval mode)
    x_tm = jnp.transpose(h2, (1, 0, 2)).reshape(L2 * B, Cp)  # time-major, flattened
    lens = jnp.asarray(len2.astype(np.int32))[:, None]       # (B, 1)
    y_flat, hn, cn = bilstm(x_tm, lens, wih_cat,
                            params["whh_f"], params["b_f"],
                            params["whh_b"], params["b_b"], L2, B)

    # pad_packed_sequence returns length == max valid length in the batch
    T_out = int(len2.max())
    y = y_flat.reshape(L2, B, 2 * H).transpose(1, 0, 2)[:, :T_out, :]

    # attention decoder + output linear
    return decoder(y, hn, cn, params, decoder_unroll_steps)


def init_params(key, input_channel, conv_dim, lstm_dim, n_classes):
    ks = jax.random.split(key, 15)
    f = lambda k, shp: (0.1 * jax.random.normal(k, shp)).astype(jnp.float32)
    H = lstm_dim
    D = 2 * lstm_dim
    return {
        # conv weights stored as (K, C_in, C_out)
        "w1": f(ks[0], (10, input_channel, conv_dim)),
        "b1": f(ks[1], (1, conv_dim)),
        "w2": f(ks[2], (10, conv_dim, conv_dim)),
        "b2": f(ks[3], (1, conv_dim)),
        # bidirectional LSTM (gate order i|f|g|o, biases folded)
        "wih_f": f(ks[4], (conv_dim, 4 * H)),
        "whh_f": f(ks[5], (H, 4 * H)),
        "b_f": f(ks[6], (1, 4 * H)),
        "wih_b": f(ks[7], (conv_dim, 4 * H)),
        "whh_b": f(ks[8], (H, 4 * H)),
        "b_b": f(ks[9], (1, 4 * H)),
        # decoder LSTMCell: input 4*lstm_dim, hidden 2*lstm_dim
        "dec_wih": f(ks[10], (2 * D, 4 * D)),
        "dec_whh": f(ks[11], (D, 4 * D)),
        "dec_b": f(ks[12], (1, 4 * D)),
        # output head (see TODO(synk) at top about in_features)
        "out_w": f(ks[13], (2 * D, n_classes)),
        "out_b": f(ks[14], (1, n_classes)),
    }


if __name__ == "__main__":
    B, L, C_in = 2, 32, 5
    conv_dim, lstm_dim, n_classes = 16, 32, 1

    key = jax.random.PRNGKey(0)
    kx, kp = jax.random.split(key)
    x = jax.random.normal(kx, (B, L, C_in), dtype=jnp.float32)
    batch_len = np.array([32, 20], dtype=np.int64)

    params = init_params(kp, C_in, conv_dim, lstm_dim, n_classes)
    out = rnatracker_forward(x, batch_len, params, decoder_unroll_steps=10)
    out = jax.block_until_ready(out)
    assert out.shape == (B, n_classes)
    print("KERNEL_OK")
</pallas_src>

<mosaic_0001>
module attributes {stable_mosaic.version = 11 : i64} {
  func.func @conv_relu_pool_mask_kernel(%arg0: i32, %arg1: memref<1x42x5xf32, #tpu.memory_space<vmem>>, %arg2: memref<10x5x128xf32, #tpu.memory_space<vmem>>, %arg3: memref<1x128xf32, #tpu.memory_space<vmem>>, %arg4: memref<1x11x1xf32, #tpu.memory_space<vmem>>, %arg5: memref<1x11x128xf32, #tpu.memory_space<vmem>>, %arg6: memref<33x128xf32, #tpu.memory_space<vmem>>) attributes {dimension_semantics = [#tpu.dimension_semantics<parallel>], iteration_bounds = array<i64: 2>, scalar_prefetch = 0 : i64, scratch_operands = 1 : i64, tpu.core_type = #tpu.core_type<tc>, window_params = [{transform_indices = @transform_0, window_bounds = array<i64: 1, 42, 5>}, {pipeline_mode = #tpu.pipeline_mode<synchronous>, transform_indices = @transform_1, window_bounds = array<i64: 10, 5, 128>}, {pipeline_mode = #tpu.pipeline_mode<synchronous>, transform_indices = @transform_2, window_bounds = array<i64: 1, 128>}, {transform_indices = @transform_3, window_bounds = array<i64: 1, 11, 1>}, {transform_indices = @transform_4, window_bounds = array<i64: 1, 11, 128>}]} {
    %cst = arith.constant 0.000000e+00 : f32
    %0 = vector.broadcast %cst : f32 to vector<33x128xf32>
    %c0 = arith.constant 0 : index
    %c0_0 = arith.constant 0 : index
    %c0_1 = arith.constant 0 : index
    %1 = vector.load %arg1[%c0, %c0_0, %c0_1] : memref<1x42x5xf32, #tpu.memory_space<vmem>>, vector<1x33x5xf32>
    %2 = vector.shape_cast %1 : vector<1x33x5xf32> to vector<33x5xf32>
    %c0_2 = arith.constant 0 : index
    %c0_3 = arith.constant 0 : index
    %c0_4 = arith.constant 0 : index
    %3 = vector.load %arg2[%c0_2, %c0_3, %c0_4] : memref<10x5x128xf32, #tpu.memory_space<vmem>>, vector<1x5x128xf32>
    %4 = vector.shape_cast %3 : vector<1x5x128xf32> to vector<5x128xf32>
    %cst_5 = arith.constant dense<0.000000e+00> : vector<33x128xf32>
    %5 = tpu.matmul %2, %4, %cst_5 {dimension_numbers = #tpu.dot_dimension_numbers<[1], [0], [0], [1], [0, 0, 1, 1], [], []>} : vector<33x5xf32>, vector<5x128xf32>, vector<33x128xf32> -> vector<33x128xf32>
    %6 = arith.addf %0, %5 : vector<33x128xf32>
    %c0_6 = arith.constant 0 : index
    %c1 = arith.constant 1 : index
    %c0_7 = arith.constant 0 : index
    %7 = vector.load %arg1[%c0_6, %c1, %c0_7] : memref<1x42x5xf32, #tpu.memory_space<vmem>>, vector<1x33x5xf32>
    %8 = vector.shape_cast %7 : vector<1x33x5xf32> to vector<33x5xf32>
    %c1_8 = arith.constant 1 : index
    %c0_9 = arith.constant 0 : index
    %c0_10 = arith.constant 0 : index
    %9 = vector.load %arg2[%c1_8, %c0_9, %c0_10] : memref<10x5x128xf32, #tpu.memory_space<vmem>>, vector<1x5x128xf32>
    %10 = vector.shape_cast %9 : vector<1x5x128xf32> to vector<5x128xf32>
    %cst_11 = arith.constant dense<0.000000e+00> : vector<33x128xf32>
    %11 = tpu.matmul %8, %10, %cst_11 {dimension_numbers = #tpu.dot_dimension_numbers<[1], [0], [0], [1], [0, 0, 1, 1], [], []>} : vector<33x5xf32>, vector<5x128xf32>, vector<33x128xf32> -> vector<33x128xf32>
    %12 = arith.addf %6, %11 : vector<33x128xf32>
    %c0_12 = arith.constant 0 : index
    %c2 = arith.constant 2 : index
    %c0_13 = arith.constant 0 : index
    %13 = vector.load %arg1[%c0_12, %c2, %c0_13] : memref<1x42x5xf32, #tpu.memory_space<vmem>>, vector<1x33x5xf32>
    %14 = vector.shape_cast %13 : vector<1x33x5xf32> to vector<33x5xf32>
    %c2_14 = arith.constant 2 : index
    %c0_15 = arith.constant 0 : index
    %c0_16 = arith.constant 0 : index
    %15 = vector.load %arg2[%c2_14, %c0_15, %c0_16] : memref<10x5x128xf32, #tpu.memory_space<vmem>>, vector<1x5x128xf32>
    %16 = vector.shape_cast %15 : vector<1x5x128xf32> to vector<5x128xf32>
    %cst_17 = arith.constant dense<0.000000e+00> : vector<33x128xf32>
    %17 = tpu.matmul %14, %16, %cst_17 {dimension_numbers = #tpu.dot_dimension_numbers<[1], [0], [0], [1], [0, 0, 1, 1], [], []>} : vector<33x5xf32>, vector<5x128xf32>, vector<33x128xf32> -> vector<33x128xf32>
    %18 = arith.addf %12, %17 : vector<33x128xf32>
    %c0_18 = arith.constant 0 : index
    %c3 = arith.constant 3 : index
    %c0_19 = arith.constant 0 : index
    %19 = vector.load %arg1[%c0_18, %c3, %c0_19] : memref<1x42x5xf32, #tpu.memory_space<vmem>>, vector<1x33x5xf32>
    %20 = vector.shape_cast %19 : vector<1x33x5xf32> to vector<33x5xf32>
    %c3_20 = arith.constant 3 : index
    %c0_21 = arith.constant 0 : index
    %c0_22 = arith.constant 0 : index
    %21 = vector.load %arg2[%c3_20, %c0_21, %c0_22] : memref<10x5x128xf32, #tpu.memory_space<vmem>>, vector<1x5x128xf32>
    %22 = vector.shape_cast %21 : vector<1x5x128xf32> to vector<5x128xf32>
    %cst_23 = arith.constant dense<0.000000e+00> : vector<33x128xf32>
    %23 = tpu.matmul %20, %22, %cst_23 {dimension_numbers = #tpu.dot_dimension_numbers<[1], [0], [0], [1], [0, 0, 1, 1], [], []>} : vector<33x5xf32>, vector<5x128xf32>, vector<33x128xf32> -> vector<33x128xf32>
    %24 = arith.addf %18, %23 : vector<33x128xf32>
    %c0_24 = arith.constant 0 : index
    %c4 = arith.constant 4 : index
    %c0_25 = arith.constant 0 : index
    %25 = vector.load %arg1[%c0_24, %c4, %c0_25] : memref<1x42x5xf32, #tpu.memory_space<vmem>>, vector<1x33x5xf32>
    %26 = vector.shape_cast %25 : vector<1x33x5xf32> to vector<33x5xf32>
    %c4_26 = arith.constant 4 : index
    %c0_27 = arith.constant 0 : index
    %c0_28 = arith.constant 0 : index
    %27 = vector.load %arg2[%c4_26, %c0_27, %c0_28] : memref<10x5x128xf32, #tpu.memory_space<vmem>>, vector<1x5x128xf32>
    %28 = vector.shape_cast %27 : vector<1x5x128xf32> to vector<5x128xf32>
    %cst_29 = arith.constant dense<0.000000e+00> : vector<33x128xf32>
    %29 = tpu.matmul %26, %28, %cst_29 {dimension_numbers = #tpu.dot_dimension_numbers<[1], [0], [0], [1], [0, 0, 1, 1], [], []>} : vector<33x5xf32>, vector<5x128xf32>, vector<33x128xf32> -> vector<33x128xf32>
    %30 = arith.addf %24, %29 : vector<33x128xf32>
    %c0_30 = arith.constant 0 : index
    %c5 = arith.constant 5 : index
    %c0_31 = arith.constant 0 : index
    %31 = vector.load %arg1[%c0_30, %c5, %c0_31] : memref<1x42x5xf32, #tpu.memory_space<vmem>>, vector<1x33x5xf32>
    %32 = vector.shape_cast %31 : vector<1x33x5xf32> to vector<33x5xf32>
    %c5_32 = arith.constant 5 : index
    %c0_33 = arith.constant 0 : index
    %c0_34 = arith.constant 0 : index
    %33 = vector.load %arg2[%c5_32, %c0_33, %c0_34] : memref<10x5x128xf32, #tpu.memory_space<vmem>>, vector<1x5x128xf32>
    %34 = vector.shape_cast %33 : vector<1x5x128xf32> to vector<5x128xf32>
    %cst_35 = arith.constant dense<0.000000e+00> : vector<33x128xf32>
    %35 = tpu.matmul %32, %34, %cst_35 {dimension_numbers = #tpu.dot_dimension_numbers<[1], [0], [0], [1], [0, 0, 1, 1], [], []>} : vector<33x5xf32>, vector<5x128xf32>, vector<33x128xf32> -> vector<33x128xf32>
    %36 = arith.addf %30, %35 : vector<33x128xf32>
    %c0_36 = arith.constant 0 : index
    %c6 = arith.constant 6 : index
    %c0_37 = arith.constant 0 : index
    %37 = vector.load %arg1[%c0_36, %c6, %c0_37] : memref<1x42x5xf32, #tpu.memory_space<vmem>>, vector<1x33x5xf32>
    %38 = vector.shape_cast %37 : vector<1x33x5xf32> to vector<33x5xf32>
    %c6_38 = arith.constant 6 : index
    %c0_39 = arith.constant 0 : index
    %c0_40 = arith.constant 0 : index
    %39 = vector.load %arg2[%c6_38, %c0_39, %c0_40] : memref<10x5x128xf32, #tpu.memory_space<vmem>>, vector<1x5x128xf32>
    %40 = vector.shape_cast %39 : vector<1x5x128xf32> to vector<5x128xf32>
    %cst_41 = arith.constant dense<0.000000e+00> : vector<33x128xf32>
    %41 = tpu.matmul %38, %40, %cst_41 {dimension_numbers = #tpu.dot_dimension_numbers<[1], [0], [0], [1], [0, 0, 1, 1], [], []>} : vector<33x5xf32>, vector<5x128xf32>, vector<33x128xf32> -> vector<33x128xf32>
    %42 = arith.addf %36, %41 : vector<33x128xf32>
    %c0_42 = arith.constant 0 : index
    %c7 = arith.constant 7 : index
    %c0_43 = arith.constant 0 : index
    %43 = vector.load %arg1[%c0_42, %c7, %c0_43] : memref<1x42x5xf32, #tpu.memory_space<vmem>>, vector<1x33x5xf32>
    %44 = vector.shape_cast %43 : vector<1x33x5xf32> to vector<33x5xf32>
    %c7_44 = arith.constant 7 : index
    %c0_45 = arith.constant 0 : index
    %c0_46 = arith.constant 0 : index
    %45 = vector.load %arg2[%c7_44, %c0_45, %c0_46] : memref<10x5x128xf32, #tpu.memory_space<vmem>>, vector<1x5x128xf32>
    %46 = vector.shape_cast %45 : vector<1x5x128xf32> to vector<5x128xf32>
    %cst_47 = arith.constant dense<0.000000e+00> : vector<33x128xf32>
    %47 = tpu.matmul %44, %46, %cst_47 {dimension_numbers = #tpu.dot_dimension_numbers<[1], [0], [0], [1], [0, 0, 1, 1], [], []>} : vector<33x5xf32>, vector<5x128xf32>, vector<33x128xf32> -> vector<33x128xf32>
    %48 = arith.addf %42, %47 : vector<33x128xf32>
    %c0_48 = arith.constant 0 : index
    %c8 = arith.constant 8 : index
    %c0_49 = arith.constant 0 : index
    %49 = vector.load %arg1[%c0_48, %c8, %c0_49] : memref<1x42x5xf32, #tpu.memory_space<vmem>>, vector<1x33x5xf32>
    %50 = vector.shape_cast %49 : vector<1x33x5xf32> to vector<33x5xf32>
    %c8_50 = arith.constant 8 : index
    %c0_51 = arith.constant 0 : index
    %c0_52 = arith.constant 0 : index
    %51 = vector.load %arg2[%c8_50, %c0_51, %c0_52] : memref<10x5x128xf32, #tpu.memory_space<vmem>>, vector<1x5x128xf32>
    %52 = vector.shape_cast %51 : vector<1x5x128xf32> to vector<5x128xf32>
    %cst_53 = arith.constant dense<0.000000e+00> : vector<33x128xf32>
    %53 = tpu.matmul %50, %52, %cst_53 {dimension_numbers = #tpu.dot_dimension_numbers<[1], [0], [0], [1], [0, 0, 1, 1], [], []>} : vector<33x5xf32>, vector<5x128xf32>, vector<33x128xf32> -> vector<33x128xf32>
    %54 = arith.addf %48, %53 : vector<33x128xf32>
    %c0_54 = arith.constant 0 : index
    %c9 = arith.constant 9 : index
    %c0_55 = arith.constant 0 : index
    %55 = vector.load %arg1[%c0_54, %c9, %c0_55] : memref<1x42x5xf32, #tpu.memory_space<vmem>>, vector<1x33x5xf32>
    %56 = vector.shape_cast %55 : vector<1x33x5xf32> to vector<33x5xf32>
    %c9_56 = arith.constant 9 : index
    %c0_57 = arith.constant 0 : index
    %c0_58 = arith.constant 0 : index
    %57 = vector.load %arg2[%c9_56, %c0_57, %c0_58] : memref<10x5x128xf32, #tpu.memory_space<vmem>>, vector<1x5x128xf32>
    %58 = vector.shape_cast %57 : vector<1x5x128xf32> to vector<5x128xf32>
    %cst_59 = arith.constant dense<0.000000e+00> : vector<33x128xf32>
    %59 = tpu.matmul %56, %58, %cst_59 {dimension_numbers = #tpu.dot_dimension_numbers<[1], [0], [0], [1], [0, 0, 1, 1], [], []>} : vector<33x5xf32>, vector<5x128xf32>, vector<33x128xf32> -> vector<33x128xf32>
    %60 = arith.addf %54, %59 : vector<33x128xf32>
    %c0_60 = arith.constant 0 : index
    %c0_61 = arith.constant 0 : index
    %61 = vector.load %arg3[%c0_60, %c0_61] : memref<1x128xf32, #tpu.memory_space<vmem>>, vector<1x128xf32>
    %62 = vector.broadcast %61 : vector<1x128xf32> to vector<33x128xf32>
    %63 = arith.addf %60, %62 : vector<33x128xf32>
    %cst_62 = arith.constant 0.000000e+00 : f32
    %64 = vector.broadcast %cst_62 : f32 to vector<33x128xf32>
    %65 = arith.maximumf %63, %64 : vector<33x128xf32>
    %c0_63 = arith.constant 0 : index
    %c0_64 = arith.constant 0 : index
    %66 = vector.load %arg6[%c0_63, %c0_64] : memref<33x128xf32, #tpu.memory_space<vmem>>, vector<33x128xf32>
    tpu.vector_store %arg6[%c0_63, %c0_64], %65 {strides = array<i32>} : memref<33x128xf32, #tpu.memory_space<vmem>>, vector<33x128xf32>,
    %c0_65 = arith.constant 0 : index
    %c0_66 = arith.constant 0 : index
    %67 = tpu.strided_load %arg6[%c0_65, %c0_66] {strides = array<i32: 3, 1>} : memref<33x128xf32, #tpu.memory_space<vmem>>, vector<11x128xf32>
    %c1_67 = arith.constant 1 : index
    %c0_68 = arith.constant 0 : index
    %68 = tpu.strided_load %arg6[%c1_67, %c0_68] {strides = array<i32: 3, 1>} : memref<33x128xf32, #tpu.memory_space<vmem>>, vector<11x128xf32>
    %c2_69 = arith.constant 2 : index
    %c0_70 = arith.constant 0 : index
    %69 = tpu.strided_load %arg6[%c2_69, %c0_70] {strides = array<i32: 3, 1>} : memref<33x128xf32, #tpu.memory_space<vmem>>, vector<11x128xf32>
    %70 = arith.maximumf %67, %68 : vector<11x128xf32>
    %71 = arith.maximumf %70, %69 : vector<11x128xf32>
    %c0_71 = arith.constant 0 : index
    %c0_72 = arith.constant 0 : index
    %c0_73 = arith.constant 0 : index
    %72 = vector.load %arg4[%c0_71, %c0_72, %c0_73] : memref<1x11x1xf32, #tpu.memory_space<vmem>>, vector<1x11x1xf32>
    %73 = vector.shape_cast %72 : vector<1x11x1xf32> to vector<11x1xf32>
    %74 = vector.broadcast %73 : vector<11x1xf32> to vector<11x128xf32>
    %75 = arith.mulf %71, %74 : vector<11x128xf32>
    %c0_74 = arith.constant 0 : index
    %c0_75 = arith.constant 0 : index
    %c0_76 = arith.constant 0 : index
    %76 = vector.load %arg5[%c0_74, %c0_75, %c0_76] : memref<1x11x128xf32, #tpu.memory_space<vmem>>, vector<1x11x128xf32>
    %77 = vector.shape_cast %76 : vector<1x11x128xf32> to vector<11x128xf32>
    %78 = vector.shape_cast %75 : vector<11x128xf32> to vector<1x11x128xf32>
    tpu.vector_store %arg5[%c0_74, %c0_75, %c0_76], %78 {strides = array<i32>} : memref<1x11x128xf32, #tpu.memory_space<vmem>>, vector<1x11x128xf32>,
    return
  }
  func.func @transform_0(%arg0: i32) -> (i32, i32, i32) {
    %c0_i32 = arith.constant 0 : i32
    %c0_i32_0 = arith.constant 0 : i32
    %c0_i32_1 = arith.constant 0 : i32
    return %arg0, %c0_i32, %c0_i32_0 : i32, i32, i32
  }
  func.func @transform_1(%arg0: i32) -> (i32, i32, i32) {
    %c0_i32 = arith.constant 0 : i32
    %c0_i32_0 = arith.constant 0 : i32
    %c0_i32_1 = arith.constant 0 : i32
    %c0_i32_2 = arith.constant 0 : i32
    return %c0_i32, %c0_i32_0, %c0_i32_1 : i32, i32, i32
  }
  func.func @transform_2(%arg0: i32) -> (i32, i32) {
    %c0_i32 = arith.constant 0 : i32
    %c0_i32_0 = arith.constant 0 : i32
    %c0_i32_1 = arith.constant 0 : i32
    return %c0_i32, %c0_i32_0 : i32, i32
  }
  func.func @transform_3(%arg0: i32) -> (i32, i32, i32) {
    %c0_i32 = arith.constant 0 : i32
    %c0_i32_0 = arith.constant 0 : i32
    %c0_i32_1 = arith.constant 0 : i32
    return %arg0, %c0_i32, %c0_i32_0 : i32, i32, i32
  }
  func.func @transform_4(%arg0: i32) -> (i32, i32, i32) {
    %c0_i32 = arith.constant 0 : i32
    %c0_i32_0 = arith.constant 0 : i32
    %c0_i32_1 = arith.constant 0 : i32
    return %arg0, %c0_i32, %c0_i32_0 : i32, i32, i32
  }
}

</mosaic_0001>

<bundles_post_ra>
// kernel: tpu_custom_call.1
= control target key start
LH: loop header
LB: loop body
LE: loop exit
PB: predicated region body
PF: predicated region fallthrough
CT: control target
= control target key end

     0   :  { %s1892_s15 = smov 0   ;;  %s2214_s0 = inlined_call_operand.vmem [shape: f32[2,42,5], index: 0, kind: input, shape index: {}]   ;;  %s2215_s1 = inlined_call_operand.vmem [shape: f32[10,5,128], index: 1, kind: input, shape index: {}]   ;;  %s2216_s2 = inlined_call_operand.vmem [shape: f32[1,128], index: 2, kind: input, shape index: {}]   ;;  %s2217_s3 = inlined_call_operand.vmem [shape: f32[2,11,1], index: 3, kind: input, shape index: {}]   ;;  %s2218_s4 = inlined_call_operand.vmem [shape: f32[2,11,128], index: 4, kind: output, shape index: {}]  }
   0x1 LB: > { %s1529_s16 = sadd.s32 4294967295, %s1862_s15   ;;  %p1533_p0 = scmp.ge.s32.totalorder %s1862_s15, 1  ;;  %s1862_s15 = sphi %s1892_s15, %s14_s15  }
   0x2   : > { %p172_p1 = scmp.lt.s32.totalorder %s1862_s15, 3 }
   0x4   : > { %p173_p2 = pnand %p1533_p0, %p172_p1 }
   0x5   : > { %p203_p3 = scmp.lt.s32.totalorder (!%p173_p2), %s1529_s16, 1 }
   0x6   : > { %176 = sbr.rel (%p173_p2) target bundleno = 327 (0x147), region = 36 }
   0xb   : > { %v1539_v0 = vld [vmem:[%s2215_s1 + $0x8] sm:$0x1f]  ;;  %vm247_vm0 = vcmask 1044480   ;;  %v1864_v1 = vmov 0.0   ;;  %v223_v2 = vld [vmem:[%s2215_s1] sm:$0x1f] }
   0xc   : > { %1673 = vmatprep.subr.mxu0 %v1864_v1  ;;  %1690 = vmatprep.subr.mxu1 %v1864_v1  ;;  %vm1865_vm1 = vmmov 0   ;;  %s2220_s16 = smov (!%p203_p3, %s1529_s16), 1  ;;  %vm231_vm2 = vcmask 39936   ;;  %v1866_v3 = vmov 0   ;;  %v1552_v4 = vld [vmem:[%s2215_s1 + $0x10] sm:$0x1f] }
   0xd   : > { %1674 = vmatpush3.msk.msra.mxu0 %vm247_vm0, %v1539_v0  ;;  %1675 = vmatprep.mubr.msk.f32.mxu0 %vm1865_vm1, %v1864_v1  ;;  %s1843_s21 = smul.u32 48, %s2220_s16  ;;  %s1611_s22 = sshll.u32 %s2220_s16, 4  ;;  %v1559_v5 = vld [vmem:[%s2215_s1 + $0x18] sm:$0x1f]  ;;  %v1566_v20 = vld [vmem:[%s2215_s1 + $0x20] sm:$0x1f] }
   0xe   : > { %1691 = vmatpush3.msk.msra.mxu1 %vm247_vm0, %v223_v2  ;;  %1692 = vmatprep.mubr.msk.f32.mxu1 %vm1865_vm1, %v1864_v1  ;;  %s212_s25 = scalar_lea.vmem %s2217_s3, %s1611_s22  ;;  %v1573_v21 = vld [vmem:[%s2215_s1 + $0x28] sm:$0x1f]  ;;  %v1580_v32 = vld [vmem:[%s2215_s1 + $0x30] sm:$0x1f]  ;;  %v1587_v33 = vld [vmem:[%s2215_s1 + $0x38] sm:$0x1f]  ;;  %s217_s26 = scalar_lea.vmem %s2218_s4, %s1611_s22 }
   0xf   : > { %1707 = vmatprep.subr.mxu0 %v1864_v1  ;;  %1724 = vmatprep.subr.mxu1 %v1864_v1  ;;  %s1928_s28 = scalar_lea.vmem %s2214_s0, %s1843_s21  ;;  %v1446_v6 = vld [vmem:[%s212_s25] sm:$0xff]  ;;  %v1447_v11 = vld [vmem:[%s212_s25 + $0x8] sm:$0x7] }
  0x10   : > { %1855 = vset.pattern.permute.xlu0 %v1866_v3  ;;  %v224_v7 = vld [vmem:[%s1928_s28 + $0x1] sm:$0xff]  ;;  %v1943_v9 = vld [vmem:[%s1928_s28 + $0x9] sm:$0xff]  ;;  %v1963_v12 = vld [vmem:[%s1928_s28 + $0x11] sm:$0xff] }
  0x11   : > { %v218_v8 = vld [vmem:[%s1928_s28] sm:$0xff]  ;;  %1450 = vperm.xlu0 %1855, %v1446_v6   ;;  %1676 = vmatmul.mubr.msk.f32.vlgmr.msra.gmra.mxu0 %vm231_vm2, %v224_v7  ;;  %v1946_v10 = vld [vmem:[%s1928_s28 + $0x8] sm:$0xff]  ;;  %v1966_v13 = vld [vmem:[%s1928_s28 + $0x10] sm:$0xff] }
  0x12   : > { %1693 = vmatmul.mubr.msk.f32.vlgmr.msra.gmra.mxu1 %vm231_vm2, %v218_v8  ;;  %1708 = vmatpush3.msk.msra.mxu0 %vm247_vm0, %v1552_v4  ;;  %v1977_v14 = vld [vmem:[%s1928_s28 + $0x19] sm:$0xff]  ;;  %v228_v16 = vld [vmem:[%s1928_s28 + $0x21] sm:$0x1]  ;;  %v449_v18 = vld [vmem:[%s1928_s28 + $0x2] sm:$0xff] }
  0x13   : > { %1725 = vmatpush3.msk.msra.mxu1 %vm247_vm0, %v1559_v5  ;;  %1678 = vmatprep.mubr.msk.f32.mxu0 %vm1865_vm1, %v1864_v1  ;;  %v1980_v15 = vld [vmem:[%s1928_s28 + $0x18] sm:$0xff]  ;;  %v222_v17 = vld [vmem:[%s1928_s28 + $0x20] sm:$0x1]  ;;  %v569_v19 = vld [vmem:[%s1928_s28 + $0x3] sm:$0xff] }
  0x14   : > { %1695 = vmatprep.mubr.msk.f32.mxu1 %vm1865_vm1, %v1864_v1  ;;  %1741 = vmatprep.subr.mxu0 %v1864_v1  ;;  %v450_v22 = vld [vmem:[%s1928_s28 + $0xa] sm:$0xff]  ;;  %v451_v24 = vld [vmem:[%s1928_s28 + $0x12] sm:$0xff]  ;;  %v452_v26 = vld [vmem:[%s1928_s28 + $0x1a] sm:$0xff] }
  0x15   : > { %1758 = vmatprep.subr.mxu1 %v1864_v1  ;;  %1679 = vmatmul.mubr.msk.f32.gmra.mxu0 %vm231_vm2, %v1943_v9  ;;  %v570_v23 = vld [vmem:[%s1928_s28 + $0xb] sm:$0xff]  ;;  %v571_v25 = vld [vmem:[%s1928_s28 + $0x13] sm:$0xff]  ;;  %v572_v27 = vld [vmem:[%s1928_s28 + $0x1b] sm:$0xff] }
  0x16   : > { %1696 = vmatmul.mubr.msk.f32.gmra.mxu1 %vm231_vm2, %v1946_v10  ;;  %1681 = vmatprep.mubr.msk.f32.mxu0 %vm1865_vm1, %v1864_v1  ;;  %v453_v28 = vld [vmem:[%s1928_s28 + $0x22] sm:$0x1]  ;;  %v573_v29 = vld [vmem:[%s1928_s28 + $0x23] sm:$0x1]  ;;  %v689_v30 = vld [vmem:[%s1928_s28 + $0x4] sm:$0xff] }
  0x17   : > { %1698 = vmatprep.mubr.msk.f32.mxu1 %vm1865_vm1, %v1864_v1  ;;  %1455 = vperm.xlu0 %1855, %v1447_v11   ;;  %v809_v31 = vld [vmem:[%s1928_s28 + $0x5] sm:$0xff]  ;;  %v810_v35 = vld [vmem:[%s1928_s28 + $0xd] sm:$0xff]  ;;  %v811_v37 = vld [vmem:[%s1928_s28 + $0x15] sm:$0xff] }
  0x18   : > { %v690_v34 = vld [vmem:[%s1928_s28 + $0xc] sm:$0xff]  ;;  %v691_v36 = vld [vmem:[%s1928_s28 + $0x14] sm:$0xff]  ;;  %v692_v38 = vld [vmem:[%s1928_s28 + $0x1c] sm:$0xff] }
  0x19   : > { %1682 = vmatmul.mubr.msk.f32.gmra.mxu0 %vm231_vm2, %v1963_v12  ;;  %v812_v39 = vld [vmem:[%s1928_s28 + $0x1d] sm:$0xff]  ;;  %v813_v41 = vld [vmem:[%s1928_s28 + $0x25] sm:$0x1]  ;;  %v929_v42 = vld [vmem:[%s1928_s28 + $0x6] sm:$0xff] }
  0x1a   : > { %1699 = vmatmul.mubr.msk.f32.gmra.mxu1 %vm231_vm2, %v1966_v13  ;;  %1684 = vmatprep.mubr.msk.f32.mxu0 %vm1865_vm1, %v1864_v1  ;;  %v693_v40 = vld [vmem:[%s1928_s28 + $0x24] sm:$0x1]  ;;  %v1049_v43 = vld [vmem:[%s1928_s28 + $0x7] sm:$0xff]  ;;  %v1050_v47 = vld [vmem:[%s1928_s28 + $0xf] sm:$0xff] }
  0x1b   : > { %1701 = vmatprep.mubr.msk.f32.mxu1 %vm1865_vm1, %v1864_v1  ;;  %v1594_v44 = vld [vmem:[%s2215_s1 + $0x40] sm:$0x1f]  ;;  %v1601_v45 = vld [vmem:[%s2215_s1 + $0x48] sm:$0x1f]  ;;  %v930_v46 = vld [vmem:[%s1928_s28 + $0xe] sm:$0xff] }
  0x1c   : > { %v931_v48 = vld [vmem:[%s1928_s28 + $0x16] sm:$0xff]  ;;  %v932_v50 = vld [vmem:[%s1928_s28 + $0x1e] sm:$0xff]  ;;  %v933_v52 = vld [vmem:[%s1928_s28 + $0x26] sm:$0x1] }
  0x1d   : > { %1685 = vmatmul.mubr.msk.f32.gmra.mxu0 %vm231_vm2, %v1977_v14  ;;  %v1051_v49 = vld [vmem:[%s1928_s28 + $0x17] sm:$0xff]  ;;  %v1052_v51 = vld [vmem:[%s1928_s28 + $0x1f] sm:$0xff]  ;;  %v1053_v53 = vld [vmem:[%s1928_s28 + $0x27] sm:$0x1] }
  0x1e   : > { %1702 = vmatmul.mubr.msk.f32.gmra.mxu1 %vm231_vm2, %v1980_v15  ;;  %1687 = vmatprep.mubr.msk.f32.mxu0 %vm1865_vm1, %v1864_v1  ;;  %v1172_v54 = vld [vmem:[%s1928_s28 + $0x20] sm:$0xff]  ;;  %v1173_v56 = vld [vmem:[%s1928_s28 + $0x28] sm:$0x1]  ;;  %v1293_v57 = vld [vmem:[%s1928_s28 + $0x29] sm:$0x1] }
  0x1f   : > { %1704 = vmatprep.mubr.msk.f32.mxu1 %vm1865_vm1, %v1864_v1  ;;  %v1292_v55 = vld [vmem:[%s1928_s28 + $0x21] sm:$0xff] }
  0x21   : > { %1688 = vmatmul.mubr.msk.f32.gmra.mxu0 %vm231_vm2, %v228_v16 }
  0x22   : > { %1705 = vmatmul.mubr.msk.f32.gmra.mxu1 %vm231_vm2, %v222_v17  ;;  %1709 = vmatprep.mubr.msk.f32.mxu0 %vm1865_vm1, %v1864_v1 }
  0x23   : > { %1726 = vmatprep.mubr.msk.f32.mxu1 %vm1865_vm1, %v1864_v1 }
  0x25   : > { %1710 = vmatmul.mubr.msk.f32.vlgmr.msra.gmra.mxu0 %vm231_vm2, %v449_v18 }
  0x26   : > { %1727 = vmatmul.mubr.msk.f32.vlgmr.msra.gmra.mxu1 %vm231_vm2, %v569_v19  ;;  %1742 = vmatpush3.msk.msra.mxu0 %vm247_vm0, %v1566_v20 }
  0x27   : > { %1759 = vmatpush3.msk.msra.mxu1 %vm247_vm0, %v1573_v21  ;;  %1712 = vmatprep.mubr.msk.f32.mxu0 %vm1865_vm1, %v1864_v1 }
  0x28   : > { %1729 = vmatprep.mubr.msk.f32.mxu1 %vm1865_vm1, %v1864_v1  ;;  %1775 = vmatprep.subr.mxu0 %v1864_v1 }
  0x29   : > { %1792 = vmatprep.subr.mxu1 %v1864_v1  ;;  %1713 = vmatmul.mubr.msk.f32.gmra.mxu0 %vm231_vm2, %v450_v22 }
  0x2a   : > { %1730 = vmatmul.mubr.msk.f32.gmra.mxu1 %vm231_vm2, %v570_v23  ;;  %1715 = vmatprep.mubr.msk.f32.mxu0 %vm1865_vm1, %v1864_v1 }
  0x2b   : > { %1732 = vmatprep.mubr.msk.f32.mxu1 %vm1865_vm1, %v1864_v1 }
  0x2d   : > { %1716 = vmatmul.mubr.msk.f32.gmra.mxu0 %vm231_vm2, %v451_v24 }
  0x2e   : > { %1733 = vmatmul.mubr.msk.f32.gmra.mxu1 %vm231_vm2, %v571_v25  ;;  %1718 = vmatprep.mubr.msk.f32.mxu0 %vm1865_vm1, %v1864_v1 }
  0x2f   : > { %1735 = vmatprep.mubr.msk.f32.mxu1 %vm1865_vm1, %v1864_v1 }
  0x31   : > { %1719 = vmatmul.mubr.msk.f32.gmra.mxu0 %vm231_vm2, %v452_v26 }
  0x32   : > { %1736 = vmatmul.mubr.msk.f32.gmra.mxu1 %vm231_vm2, %v572_v27  ;;  %1721 = vmatprep.mubr.msk.f32.mxu0 %vm1865_vm1, %v1864_v1 }
  0x33   : > { %1738 = vmatprep.mubr.msk.f32.mxu1 %vm1865_vm1, %v1864_v1 }
  0x35   : > { %1722 = vmatmul.mubr.msk.f32.gmra.mxu0 %vm231_vm2, %v453_v28 }
  0x36   : > { %1739 = vmatmul.mubr.msk.f32.gmra.mxu1 %vm231_vm2, %v573_v29  ;;  %1743 = vmatprep.mubr.msk.f32.mxu0 %vm1865_vm1, %v1864_v1 }
  0x37   : > { %1760 = vmatprep.mubr.msk.f32.mxu1 %vm1865_vm1, %v1864_v1 }
  0x39   : > { %1744 = vmatmul.mubr.msk.f32.vlgmr.msra.gmra.mxu0 %vm231_vm2, %v689_v30 }
  0x3a   : > { %1761 = vmatmul.mubr.msk.f32.vlgmr.msra.gmra.mxu1 %vm231_vm2, %v809_v31  ;;  %1776 = vmatpush3.msk.msra.mxu0 %vm247_vm0, %v1580_v32 }
  0x3b   : > { %1793 = vmatpush3.msk.msra.mxu1 %vm247_vm0, %v1587_v33  ;;  %1746 = vmatprep.mubr.msk.f32.mxu0 %vm1865_vm1, %v1864_v1 }
  0x3c   : > { %1763 = vmatprep.mubr.msk.f32.mxu1 %vm1865_vm1, %v1864_v1  ;;  %1809 = vmatprep.subr.mxu0 %v1864_v1 }
  0x3d   : > { %1826 = vmatprep.subr.mxu1 %v1864_v1  ;;  %1747 = vmatmul.mubr.msk.f32.gmra.mxu0 %vm231_vm2, %v690_v34 }
  0x3e   : > { %1764 = vmatmul.mubr.msk.f32.gmra.mxu1 %vm231_vm2, %v810_v35  ;;  %1749 = vmatprep.mubr.msk.f32.mxu0 %vm1865_vm1, %v1864_v1 }
  0x3f   : > { %1766 = vmatprep.mubr.msk.f32.mxu1 %vm1865_vm1, %v1864_v1 }
  0x41   : > { %1750 = vmatmul.mubr.msk.f32.gmra.mxu0 %vm231_vm2, %v691_v36 }
  0x42   : > { %1767 = vmatmul.mubr.msk.f32.gmra.mxu1 %vm231_vm2, %v811_v37  ;;  %1752 = vmatprep.mubr.msk.f32.mxu0 %vm1865_vm1, %v1864_v1 }
  0x43   : > { %1769 = vmatprep.mubr.msk.f32.mxu1 %vm1865_vm1, %v1864_v1 }
  0x45   : > { %1753 = vmatmul.mubr.msk.f32.gmra.mxu0 %vm231_vm2, %v692_v38 }
  0x46   : > { %1770 = vmatmul.mubr.msk.f32.gmra.mxu1 %vm231_vm2, %v812_v39  ;;  %1755 = vmatprep.mubr.msk.f32.mxu0 %vm1865_vm1, %v1864_v1 }
  0x47   : > { %1772 = vmatprep.mubr.msk.f32.mxu1 %vm1865_vm1, %v1864_v1 }
  0x49   : > { %1756 = vmatmul.mubr.msk.f32.gmra.mxu0 %vm231_vm2, %v693_v40 }
  0x4a   : > { %1773 = vmatmul.mubr.msk.f32.gmra.mxu1 %vm231_vm2, %v813_v41  ;;  %1777 = vmatprep.mubr.msk.f32.mxu0 %vm1865_vm1, %v1864_v1 }
  0x4b   : > { %1794 = vmatprep.mubr.msk.f32.mxu1 %vm1865_vm1, %v1864_v1 }
  0x4d   : > { %1778 = vmatmul.mubr.msk.f32.vlgmr.msra.gmra.mxu0 %vm231_vm2, %v929_v42 }
  0x4e   : > { %1795 = vmatmul.mubr.msk.f32.vlgmr.msra.gmra.mxu1 %vm231_vm2, %v1049_v43  ;;  %1810 = vmatpush3.msk.msra.mxu0 %vm247_vm0, %v1594_v44 }
  0x4f   : > { %1827 = vmatpush3.msk.msra.mxu1 %vm247_vm0, %v1601_v45  ;;  %1780 = vmatprep.mubr.msk.f32.mxu0 %vm1865_vm1, %v1864_v1 }
  0x50   : > { %1797 = vmatprep.mubr.msk.f32.mxu1 %vm1865_vm1, %v1864_v1 }
  0x51   : > { %1781 = vmatmul.mubr.msk.f32.gmra.mxu0 %vm231_vm2, %v930_v46 }
  0x52   : > { %1798 = vmatmul.mubr.msk.f32.gmra.mxu1 %vm231_vm2, %v1050_v47  ;;  %1783 = vmatprep.mubr.msk.f32.mxu0 %vm1865_vm1, %v1864_v1 }
  0x53   : > { %1800 = vmatprep.mubr.msk.f32.mxu1 %vm1865_vm1, %v1864_v1 }
  0x55   : > { %1784 = vmatmul.mubr.msk.f32.gmra.mxu0 %vm231_vm2, %v931_v48 }
  0x56   : > { %1801 = vmatmul.mubr.msk.f32.gmra.mxu1 %vm231_vm2, %v1051_v49  ;;  %1786 = vmatprep.mubr.msk.f32.mxu0 %vm1865_vm1, %v1864_v1 }
  0x57   : > { %1803 = vmatprep.mubr.msk.f32.mxu1 %vm1865_vm1, %v1864_v1 }
  0x59   : > { %1787 = vmatmul.mubr.msk.f32.gmra.mxu0 %vm231_vm2, %v932_v50 }
  0x5a   : > { %1804 = vmatmul.mubr.msk.f32.gmra.mxu1 %vm231_vm2, %v1052_v51  ;;  %1789 = vmatprep.mubr.msk.f32.mxu0 %vm1865_vm1, %v1864_v1 }
  0x5b   : > { %1806 = vmatprep.mubr.msk.f32.mxu1 %vm1865_vm1, %v1864_v1 }
  0x5d   : > { %1790 = vmatmul.mubr.msk.f32.gmra.mxu0 %vm231_vm2, %v933_v52 }
  0x5e   : > { %1807 = vmatmul.mubr.msk.f32.gmra.mxu1 %vm231_vm2, %v1053_v53  ;;  %1811 = vmatprep.mubr.msk.f32.mxu0 %vm1865_vm1, %v1864_v1 }
  0x5f   : > { %1828 = vmatprep.mubr.msk.f32.mxu1 %vm1865_vm1, %v1864_v1 }
  0x61   : > { %1812 = vmatmul.mubr.msk.f32.vlgmr.msra.gmra.mxu0 %vm231_vm2, %v1946_v10 }
  0x62   : > { %1829 = vmatmul.mubr.msk.f32.vlgmr.msra.gmra.mxu1 %vm231_vm2, %v1943_v9  ;;  %1814 = vmatprep.mubr.msk.f32.mxu0 %vm1865_vm1, %v1864_v1 }
  0x63   : > { %1831 = vmatprep.mubr.msk.f32.mxu1 %vm1865_vm1, %v1864_v1 }
  0x65   : > { %1815 = vmatmul.mubr.msk.f32.gmra.mxu0 %vm231_vm2, %v1966_v13 }
  0x66   : > { %1832 = vmatmul.mubr.msk.f32.gmra.mxu1 %vm231_vm2, %v1963_v12  ;;  %1817 = vmatprep.mubr.msk.f32.mxu0 %vm1865_vm1, %v1864_v1 }
  0x67   : > { %1834 = vmatprep.mubr.msk.f32.mxu1 %vm1865_vm1, %v1864_v1 }
  0x69   : > { %1818 = vmatmul.mubr.msk.f32.gmra.mxu0 %vm231_vm2, %v1980_v15 }
  0x6a   : > { %1835 = vmatmul.mubr.msk.f32.gmra.mxu1 %vm231_vm2, %v1977_v14  ;;  %1820 = vmatprep.mubr.msk.f32.mxu0 %vm1865_vm1, %v1864_v1 }
  0x6b   : > { %1837 = vmatprep.mubr.msk.f32.mxu1 %vm1865_vm1, %v1864_v1 }
  0x6d   : > { %1821 = vmatmul.mubr.msk.f32.gmra.mxu0 %vm231_vm2, %v1172_v54 }
  0x6e   : > { %1838 = vmatmul.mubr.msk.f32.gmra.mxu1 %vm231_vm2, %v1292_v55  ;;  %1823 = vmatprep.mubr.msk.f32.mxu0 %vm1865_vm1, %v1864_v1 }
  0x6f   : > { %1840 = vmatprep.mubr.msk.f32.mxu1 %vm1865_vm1, %v1864_v1 }
  0x71   : > { %1824 = vmatmul.mubr.msk.f32.gmra.mxu0 %vm231_vm2, %v1173_v56 }
  0x72   : > { %1841 = vmatmul.mubr.msk.f32.gmra.mxu1 %vm231_vm2, %v1293_v57 }
  0xd1   : > { %v317_v58 = vpop.f32.mrf.mxu0 }
  0xd2   : > { %v425_v59 = vpop.f32.mrf.mxu1 }
  0xd3   : > { %v2182_v60 = vadd.f32 %v425_v59, %v317_v58  ;;  %v1677_v61 = vpop.f32.mrf.mxu0 }
  0xd4   : > { %v1694_v62 = vpop.f32.mrf.mxu1 }
  0xd5   : > { %v322_v63 = vpop.f32.mrf.mxu0 }
  0xd6   : > { %v430_v0 = vpop.f32.mrf.mxu1 }
  0xd7   : > { %v2184_v2 = vadd.f32 %v430_v0, %v322_v63  ;;  %v1680_v3 = vpop.f32.mrf.mxu0 }
  0xd8   : > { %v1697_v4 = vpop.f32.mrf.mxu1 }
  0xd9   : > { %v327_v5 = vpop.f32.mrf.mxu0 }
  0xda   : > { %v435_v1 = vpop.f32.mrf.mxu1 }
  0xdb   : > { %v2186_v6 = vadd.f32 %v435_v1, %v327_v5  ;;  %v1683_v7 = vpop.f32.mrf.mxu0 }
  0xdc   : > { %v1700_v8 = vpop.f32.mrf.mxu1 }
  0xdd   : > { %v332_v9 = vpop.f32.mrf.mxu0 }
  0xde   : > { %v440_v10 = vpop.f32.mrf.mxu1 }
  0xdf   : > { %v2188_v11 = vadd.f32 %v440_v10, %v332_v9  ;;  %v1686_v12 = vpop.f32.mrf.mxu0 }
  0xe0   : > { %v1703_v13 = vpop.f32.mrf.mxu1 }
  0xe1   : > { %v337_v14 = vpop.f32.mrf.mxu0 }
  0xe2   : > { %v445_v15 = vpop.f32.mrf.mxu1 }
  0xe3   : > { %v2190_v16 = vadd.f32 %v445_v15, %v337_v14  ;;  %v1689_v17 = vpop.f32.mrf.mxu0 }
  0xe4   : > { %v1706_v18 = vpop.f32.mrf.mxu1 }
  0xe5   : > { %v540_v19 = vpop.f32.mrf.mxu0 }
  0xe6   : > { %v660_v20 = vpop.f32.mrf.mxu1  ;;  %v564_v0 = vadd.f32 %v540_v19, %v2182_v60 }
  0xe7   : > { %v1711_v21 = vpop.f32.mrf.mxu0 }
  0xe8   : > { %v1728_v22 = vpop.f32.mrf.mxu1  ;;  %v684_v7 = vadd.f32 %v660_v20, %v564_v0 }
  0xe9   : > { %v545_v23 = vpop.f32.mrf.mxu0 }
  0xea   : > { %v665_v24 = vpop.f32.mrf.mxu1  ;;  %v565_v8 = vadd.f32 %v545_v23, %v2184_v2 }
  0xeb   : > { %v1714_v25 = vpop.f32.mrf.mxu0 }
  0xec   : > { %v1731_v26 = vpop.f32.mrf.mxu1  ;;  %v685_v15 = vadd.f32 %v665_v24, %v565_v8 }
  0xed   : > { %v550_v27 = vpop.f32.mrf.mxu0 }
  0xee   : > { %v670_v28 = vpop.f32.mrf.mxu1  ;;  %v566_v17 = vadd.f32 %v550_v27, %v2186_v6 }
  0xef   : > { %v1717_v29 = vpop.f32.mrf.mxu0 }
  0xf0   : > { %v1734_v30 = vpop.f32.mrf.mxu1  ;;  %v686_v26 = vadd.f32 %v670_v28, %v566_v17 }
  0xf1   : > { %v555_v31 = vpop.f32.mrf.mxu0 }
  0xf2   : > { %v675_v32 = vpop.f32.mrf.mxu1  ;;  %v567_v29 = vadd.f32 %v555_v31, %v2188_v11  ;;  %v1608_v11 = vld [vmem:[%s2216_s2] ss:$0 sm:$0xff] }
  0xf3   : > { %v1720_v33 = vpop.f32.mrf.mxu0 }
  0xf4   : > { %v1737_v34 = vpop.f32.mrf.mxu1 }
  0xf5   : > { %v560_v35 = vpop.f32.mrf.mxu0 }
  0xf6   : > { %v2192_v36 = vpop.f32.mrf.mxu1  ;;  %v568_v24 = vadd.f32 %v560_v35, %v2190_v16 }
  0xf7   : > { %v1723_v37 = vpop.f32.mrf.mxu0 }
  0xf8   : > { %v1740_v38 = vpop.f32.mrf.mxu1 }
  0xf9   : > { %v780_v39 = vpop.f32.mrf.mxu0  ;;  %v687_v38 = vadd.f32 %v675_v32, %v567_v29 }
  0xfa   : > { %v900_v40 = vpop.f32.mrf.mxu1  ;;  %v804_v12 = vadd.f32 %v780_v39, %v684_v7 }
  0xfb   : > { %v1745_v41 = vpop.f32.mrf.mxu0 }
  0xfc   : > { %v1762_v42 = vpop.f32.mrf.mxu1  ;;  %v924_v22 = vadd.f32 %v900_v40, %v804_v12 }
  0xfd   : > { %v785_v43 = vpop.f32.mrf.mxu0 }
  0xfe   : > { %v905_v44 = vpop.f32.mrf.mxu1  ;;  %v805_v25 = vadd.f32 %v785_v43, %v685_v15 }
  0xff   : > { %v1748_v45 = vpop.f32.mrf.mxu0 }
 0x100   : > { %v1765_v46 = vpop.f32.mrf.mxu1  ;;  %v925_v23 = vadd.f32 %v905_v44, %v805_v25  ;;  %v688_v44 = vadd.f32 %v2192_v36, %v568_v24 }
 0x101   : > { %v790_v47 = vpop.f32.mrf.mxu0 }
 0x102   : > { %v910_v48 = vpop.f32.mrf.mxu1  ;;  %v806_v33 = vadd.f32 %v790_v47, %v686_v26 }
 0x103   : > { %v1751_v49 = vpop.f32.mrf.mxu0 }
 0x104   : > { %v1768_v50 = vpop.f32.mrf.mxu1  ;;  %v926_v41 = vadd.f32 %v910_v48, %v806_v33 }
 0x105   : > { %v795_v51 = vpop.f32.mrf.mxu0 }
 0x106   : > { %v915_v52 = vpop.f32.mrf.mxu1  ;;  %v807_v42 = vadd.f32 %v795_v51, %v687_v38 }
 0x107   : > { %v1754_v53 = vpop.f32.mrf.mxu0 }
 0x108   : > { %v1771_v54 = vpop.f32.mrf.mxu1  ;;  %v927_v35 = vadd.f32 %v915_v52, %v807_v42 }
 0x109   : > { %v800_v55 = vpop.f32.mrf.mxu0 }
 0x10a   : > { %v2194_v56 = vpop.f32.mrf.mxu1  ;;  %v808_v49 = vadd.f32 %v800_v55, %v688_v44 }
 0x10b   : > { %v1757_v57 = vpop.f32.mrf.mxu0 }
 0x10c   : > { %v1774_v58 = vpop.f32.mrf.mxu1 }
 0x10d   : > { %v1020_v59 = vpop.f32.mrf.mxu0 }
 0x10e   : > { %v1140_v61 = vpop.f32.mrf.mxu1  ;;  %v1044_v20 = vadd.f32 %v1020_v59, %v924_v22 }
 0x10f   : > { %v1779_v62 = vpop.f32.mrf.mxu0 }
 0x110   : > { %v1796_v63 = vpop.f32.mrf.mxu1  ;;  %v1164_v6 = vadd.f32 %v1140_v61, %v1044_v20 }
 0x111   : > { %v1025_v3 = vpop.f32.mrf.mxu0  ;;  %v928_v63 = vadd.f32 %v2194_v56, %v808_v49 }
 0x112   : > { %v1145_v4 = vpop.f32.mrf.mxu1  ;;  %v1045_v27 = vadd.f32 %v1025_v3, %v925_v23 }
 0x113   : > { %v1782_v5 = vpop.f32.mrf.mxu0 }
 0x114   : > { %v1799_v1 = vpop.f32.mrf.mxu1  ;;  %v1165_v45 = vadd.f32 %v1145_v4, %v1045_v27 }
 0x115   : > { %v1030_v9 = vpop.f32.mrf.mxu0 }
 0x116   : > { %v1150_v10 = vpop.f32.mrf.mxu1  ;;  %v1046_v46 = vadd.f32 %v1030_v9, %v926_v41 }
 0x117   : > { %v1785_v13 = vpop.f32.mrf.mxu0 }
 0x118   : > { %v1802_v14 = vpop.f32.mrf.mxu1  ;;  %v1166_v54 = vadd.f32 %v1150_v10, %v1046_v46 }
 0x119   : > { %v1035_v18 = vpop.f32.mrf.mxu0 }
 0x11a   : > { %v1155_v21 = vpop.f32.mrf.mxu1  ;;  %v1047_v57 = vadd.f32 %v1035_v18, %v927_v35 }
 0x11b   : > { %v1788_v60 = vpop.f32.mrf.mxu0 }
 0x11c   : > { %v1805_v19 = vpop.f32.mrf.mxu1  ;;  %v1167_v5 = vadd.f32 %v1155_v21, %v1047_v57 }
 0x11d   : > { %v1040_v30 = vpop.f32.mrf.mxu0 }
 0x11e   : > { %v1160_v2 = vpop.f32.mrf.mxu1  ;;  %v1048_v52 = vadd.f32 %v1040_v30, %v928_v63 }
 0x11f   : > { %v1791_v34 = vpop.f32.mrf.mxu0 }
 0x120   : > { %v1808_v37 = vpop.f32.mrf.mxu1  ;;  %v1168_v14 = vadd.f32 %v1160_v2, %v1048_v52 }
 0x121   : > { %v1260_v39 = vpop.f32.mrf.mxu0  ;;  %v1451_v37 = vpop.permute.xlu0 %1450 }
 0x122   : > { %v1380_v40 = vpop.f32.mrf.mxu1  ;;  %v1284_v43 = vadd.f32 %v1260_v39, %v1164_v6 }
 0x123   : > { %v1813_v28 = vpop.f32.mrf.mxu0 }
 0x124   : > { %v1830_v31 = vpop.f32.mrf.mxu1  ;;  %v1404_v32 = vadd.f32 %v1380_v40, %v1284_v43 }
 0x125   : > { %v1265_v47 = vpop.f32.mrf.mxu0  ;;  %v1456_v41 = vpop.permute.xlu0 %1455 }
 0x126   : > { %v1385_v16 = vpop.f32.mrf.mxu1  ;;  %v1416_v50 = vadd.f32 %v1608_v11, %v1404_v32  ;;  %v1285_v53 = vadd.f32 %v1265_v47, %v1165_v45 }
 0x127   : > { %v1816_v48 = vpop.f32.mrf.mxu0 }
 0x128   : > { %v1833_v51 = vpop.f32.mrf.mxu1  ;;  %v1421_v58 = vmax.f32 %v1416_v50, 0.0  ;;  %v1405_v59 = vadd.f32 %v1385_v16, %v1285_v53 }
 0x129   : > { %v1270_v61 = vpop.f32.mrf.mxu0 }
 0x12a   : > { %v1390_v62 = vpop.f32.mrf.mxu1  ;;  %1426 = vst [vmem:[#allocation2] sm:$0xff] %v1421_v58  ;;  %v1417_v36 = vadd.f32 %v1608_v11, %v1405_v59  ;;  %v1286_v0 = vadd.f32 %v1270_v61, %v1166_v54 }
 0x12b   : > { %v1819_v3 = vpop.f32.mrf.mxu0 }
 0x12c   : > { %v1836_v4 = vpop.f32.mrf.mxu1  ;;  %v1422_v55 = vmax.f32 %v1417_v36, 0.0  ;;  %v1406_v1 = vadd.f32 %v1390_v62, %v1286_v0 }
 0x12d   : > { %v1275_v7 = vpop.f32.mrf.mxu0 }
 0x12e   : > { %v1395_v8 = vpop.f32.mrf.mxu1  ;;  %1427 = vst [vmem:[#allocation2 + $0x8] sm:$0xff] %v1422_v55  ;;  %v1418_v9 = vadd.f32 %v1608_v11, %v1406_v1  ;;  %v1287_v10 = vadd.f32 %v1275_v7, %v1167_v5 }
 0x12f   : > { %v1822_v12 = vpop.f32.mrf.mxu0 }
 0x130   : > { %v1839_v13 = vpop.f32.mrf.mxu1  ;;  %v1423_v15 = vmax.f32 %v1418_v9, 0.0  ;;  %v1407_v17 = vadd.f32 %v1395_v8, %v1287_v10 }
 0x131   : > { %v1280_v56 = vpop.f32.mrf.mxu0 }
 0x132   : > { %v1400_v18 = vpop.f32.mrf.mxu1  ;;  %1428 = vst [vmem:[#allocation2 + $0x10] sm:$0xff] %v1423_v15  ;;  %v1419_v22 = vadd.f32 %v1608_v11, %v1407_v17  ;;  %v1288_v25 = vadd.f32 %v1280_v56, %v1168_v14 }
 0x133   : > { %v1825_v21 = vpop.f32.mrf.mxu0 }
 0x134   : > { %v1842_v60 = vpop.f32.mrf.mxu1  ;;  %v1424_v19 = vmax.f32 %v1419_v22, 0.0  ;;  %v1408_v26 = vadd.f32 %v1400_v18, %v1288_v25 }
 0x136   : > { %1429 = vst [vmem:[#allocation2 + $0x18] sm:$0xff] %v1424_v19  ;;  %v1420_v29 = vadd.f32 %v1608_v11, %v1408_v26 }
 0x138   : > { %v1425_v20 = vmax.f32 %v1420_v29, 0.0 }
 0x139   : > { %v1431_v30 = vld [vmem:[#allocation2] ss:$3 sm:$0xff]  ;;  %v1435_v23 = vld [vmem:[#allocation2 + $0x1] ss:$3 sm:$0xff]  ;;  %v1439_v2 = vld [vmem:[#allocation2 + $0x2] ss:$3 sm:$0xff] }
 0x13a   : > { %1430 = vst [vmem:[#allocation2 + $0x20] sm:$0x1] %v1425_v20  ;;  %v1442_v33 = vmax.f32 %v1431_v30, %v1435_v23 }
 0x13c   : > { %v1444_v34 = vmax.f32 %v1442_v33, %v1439_v2 }
 0x13d   : > { %v1433_v38 = vld [vmem:[#allocation2 + $0x18] ss:$3 sm:$0x7]  ;;  %v1437_v24 = vld [vmem:[#allocation2 + $0x19] ss:$3 sm:$0x7] }
 0x13e   : > { %v1458_v6 = vmul.f32 %v1451_v37, %v1444_v34  ;;  %v1443_v27 = vmax.f32 %v1433_v38, %v1437_v24 }
 0x140   : > { %1460 = vst [vmem:[%s217_s26] sm:$0xff] %v1458_v6 }
 0x141   : > { %v1441_v39 = vld [vmem:[#allocation2 + $0x1a] ss:$3 sm:$0x7] }
 0x142   : > { %v1445_v40 = vmax.f32 %v1443_v27, %v1441_v39 }
 0x144   : > { %v1459_v42 = vmul.f32 %v1456_v41, %v1445_v40 }
 0x146   : > { %1461 = vst [vmem:[%s217_s26 + $0x8] sm:$0x7] %v1459_v42 }
 0x147 PF: > { %s14_s15 = sadd.s32 1, %s1862_s15  }
 0x148   : > { %p11_p4 = scmp.ge.s32.totalorder %s14_s15, 4  }
 0x14a   :  { %13 = sbr.rel (!%p11_p4) target bundleno = 1 (0x1), region = 83 }

</bundles_post_ra>
